<compile_context>
chip_gen: v7x
topology: tpu7x:2x2x1
jax: 0.10.0
libtpu: 0.0.40
codegen_flags: <defaults>
</compile_context>

<pallas_src>
import math
import jax
import jax.numpy as jnp
from jax.experimental import pallas as pl
from jax.experimental.pallas import tpu as pltpu


# ----------------------------- glue: sincos pos emb (exact port of torch code) -------------
def build_2d_sincos_posemb(h, w, embed_dim, temperature=10000.0):
    """Literal port of the torch build_2d_sincos_posemb (including its (w,h)->(h,w) quirk)."""
    assert embed_dim % 4 == 0
    grid_w = jnp.arange(w, dtype=jnp.float32)
    grid_h = jnp.arange(h, dtype=jnp.float32)
    # torch.meshgrid default indexing is 'ij'
    gw, gh = jnp.meshgrid(grid_w, grid_h, indexing="ij")  # shapes (w, h)
    pos_dim = embed_dim // 4
    omega = jnp.arange(pos_dim, dtype=jnp.float32) / pos_dim
    omega = 1.0 / (temperature ** omega)
    out_w = gw.reshape(-1)[:, None] * omega[None, :]      # (w*h, pos_dim)
    out_h = gh.reshape(-1)[:, None] * omega[None, :]      # (w*h, pos_dim)
    pos_seq = jnp.concatenate(
        [jnp.sin(out_w), jnp.cos(out_w), jnp.sin(out_h), jnp.cos(out_h)], axis=1
    )  # (w*h, embed_dim)
    # rearrange 'b (h w) d -> b d h w'  (seq re-interpreted as h-major, as in the torch code)
    pos_emb = pos_seq.reshape(h, w, embed_dim).transpose(2, 0, 1)[None]  # (1, D, h, w)
    return pos_emb


# ----------------------------- Pallas kernel ------------------------------------------------
def _adapter_kernel(x_ref, w_ref, pb_ref, o_ref):
    # x_ref:  (R, K)  bf16 patch-token tile
    # w_ref:  (K, D)  bf16 projection weight (resident across the grid)
    # pb_ref: (R, D)  f32  positional embedding tokens + projection bias (pre-folded)
    # o_ref:  (R, D)  f32  output tokens
    acc = jnp.dot(x_ref[...], w_ref[...], preferred_element_type=jnp.float32)  # MXU, f32 acc
    o_ref[...] = (acc + pb_ref[...]).astype(o_ref.dtype)                       # f32 epilogue


# ----------------------------- tiling / VMEM helpers ----------------------------------------
def _pick_row_tile(n, target=512):
    """Largest row tile <= target that divides n and is a multiple of 8 (or the full n)."""
    if n <= target:
        return n
    best = 0
    for r in range(8, target + 1, 8):
        if n % r == 0:
            best = r
    return best if best > 0 else n  # fallback: full slab (block == full dim is always legal)


def patched_input_adapter_forward(x, proj_w, proj_b, pos_emb_4d, P_H, P_W,
                                  row_tile_target=512):
    """x: (B, C, H, W) f32. proj_w: (D, C, P_H, P_W). proj_b: (D,).
    pos_emb_4d: (1, D, h_posemb, w_posemb).  Returns (B, N_H*N_W, D) f32."""
    B, C, H, W = x.shape
    D = proj_w.shape[0]
    assert H % P_H == 0 and W % P_W == 0
    N_H, N_W = H // P_H, W // P_W
    N = N_H * N_W
    K = C * P_H * P_W

    # --- glue: extract non-overlapping patches, flatten in (C, P_H, P_W) order (matches
    #     Conv2d weight layout). Cast to bf16 so this relayout's HBM write + kernel read
    #     are half-width.
    # TODO(synk): fully fusing this patch-extraction swizzle into the kernel (perf review #1)
    #     needs a multi-axis transpose of sub-(8,128) blocks in VMEM, which Mosaic does not
    #     lower reliably; kept as a single bf16 relayout in the wrapper instead.
    xp = x.reshape(B, C, N_H, P_H, N_W, P_W)
    xp = xp.transpose(0, 2, 4, 1, 3, 5).reshape(B, N, K).astype(jnp.bfloat16)

    # --- glue: conv-as-matmul weight (bf16 for the MXU path)
    w_mat = proj_w.reshape(D, K).T.astype(jnp.bfloat16)          # (K, D)

    # --- glue: positional embedding tokens; fold the projection bias in (one fewer stream).
    h_pe, w_pe = pos_emb_4d.shape[2], pos_emb_4d.shape[3]
    # TODO(synk): PyTorch bicubic F.interpolate (a=-0.75, align_corners=False) not ported; we
    # require matching grid sizes where the interpolation is an exact identity.
    assert (h_pe, w_pe) == (N_H, N_W), "pos_emb grid must match token grid (identity interp)"
    pos_tok = pos_emb_4d[0].transpose(1, 2, 0).reshape(N, D).astype(jnp.float32)   # (N, D)
    pos_plus_bias = pos_tok + proj_b.reshape(1, D).astype(jnp.float32)             # (N, D) f32

    # --- row tiling over tokens (lane dim is D; D should be a multiple of 128 in real
    #     configs for unmasked stores — D=32 demo accepts the masked-store penalty).
    R = _pick_row_tile(N, row_tile_target)
    assert N % R == 0
    n_tiles = N // R

    # --- explicit VMEM budget: double-buffered tiles + resident weight, capped under v7x 64MiB
    bytes_x = R * K * 2
    bytes_pos = R * D * 4
    bytes_out = R * D * 4
    bytes_w = K * D * 2
    needed = 2 * (bytes_x + bytes_pos + bytes_out) + 2 * bytes_w
    vmem_limit = int(min(60 * 2**20, max(2 * needed, 16 * 2**20)))

    # grid = (token row tiles, batch): batch innermost so the pos/bias tile (index depends
    # only on the tile axis) stays resident and is streamed from HBM only once.
    grid = (n_tiles, B)
    out = pl.pallas_call(
        _adapter_kernel,
        out_shape=jax.ShapeDtypeStruct((B, N, D), jnp.float32),
        grid_spec=pltpu.PrefetchScalarGridSpec(
            num_scalar_prefetch=0,
            grid=grid,
            in_specs=[
                pl.BlockSpec((None, R, K), lambda t, b: (b, t, 0)),   # patch-token row tile
                pl.BlockSpec((K, D), lambda t, b: (0, 0)),            # weight (resident)
                pl.BlockSpec((R, D), lambda t, b: (t, 0)),            # pos + bias tile
            ],
            out_specs=pl.BlockSpec((None, R, D), lambda t, b: (b, t, 0)),
        ),
        compiler_params=pltpu.CompilerParams(
            dimension_semantics=("parallel", "parallel"),   # shardable across v7x's 2 TCs
            vmem_limit_bytes=vmem_limit,
        ),
    )(xp, w_mat, pos_plus_bias)
    return out


# ----------------------------- module-equivalent setup --------------------------------------
def make_params(key, num_channels, dim_tokens, P_H, P_W):
    """Deterministic init mimicking nn.Conv2d defaults (kaiming-uniform-ish bounds)."""
    k_w, k_b = jax.random.split(key)
    fan_in = num_channels * P_H * P_W
    bound = 1.0 / math.sqrt(fan_in)
    proj_w = jax.random.uniform(
        k_w, (dim_tokens, num_channels, P_H, P_W), jnp.float32, -bound, bound
    )
    proj_b = jax.random.uniform(k_b, (dim_tokens,), jnp.float32, -bound, bound)
    return proj_w, proj_b


if __name__ == "__main__":
    # Module config: PatchedInputAdapter(num_channels=4, stride_level=1, patch_size_full=4,
    #                                    dim_tokens=32, image_size=16)
    num_channels = 4
    stride_level = 1
    patch_size_full = 4
    dim_tokens = 32
    image_size = (16, 16)

    P_H = max(1, patch_size_full // stride_level)
    P_W = max(1, patch_size_full // stride_level)
    h_posemb = image_size[0] // (stride_level * P_H)
    w_posemb = image_size[1] // (stride_level * P_W)

    key = jax.random.PRNGKey(0)
    k_x, k_p = jax.random.split(key)

    B, C, H, W = 2, num_channels, image_size[0], image_size[1]
    x = jax.random.normal(k_x, (B, C, H, W), jnp.float32)

    proj_w, proj_b = make_params(k_p, num_channels, dim_tokens, P_H, P_W)
    pos_emb_4d = build_2d_sincos_posemb(h_posemb, w_posemb, dim_tokens)  # (1, D, h, w)

    fwd = jax.jit(patched_input_adapter_forward, static_argnums=(4, 5, 6))
    out = fwd(x, proj_w, proj_b, pos_emb_4d, P_H, P_W, 512)
    out = jax.block_until_ready(out)

    # lightweight reference check (pure JAX, f32 math). Kernel matmul path is bf16 so use a
    # correspondingly loose tolerance.
    N_H, N_W = H // P_H, W // P_W
    xp = x.reshape(B, C, N_H, P_H, N_W, P_W).transpose(0, 2, 4, 1, 3, 5)
    xp = xp.reshape(B, N_H * N_W, C * P_H * P_W)
    ref = jnp.einsum("bnk,kd->bnd", xp, proj_w.reshape(dim_tokens, -1).T) + proj_b[None, None, :]
    ref = ref + pos_emb_4d[0].transpose(1, 2, 0).reshape(1, N_H * N_W, dim_tokens)
    assert out.shape == (B, N_H * N_W, dim_tokens)
    assert out.dtype == jnp.float32
    assert jnp.allclose(out, ref, atol=5e-2, rtol=5e-2)

    print("KERNEL_OK")
</pallas_src>

<mosaic_0001>
module attributes {stable_mosaic.version = 11 : i64} {
  func.func @_adapter_kernel(%arg0: i32, %arg1: i32, %arg2: memref<1x16x64xbf16, #tpu.memory_space<vmem>>, %arg3: memref<64x32xbf16, #tpu.memory_space<vmem>>, %arg4: memref<16x32xf32, #tpu.memory_space<vmem>>, %arg5: memref<1x16x32xf32, #tpu.memory_space<vmem>>) attributes {dimension_semantics = [#tpu.dimension_semantics<parallel>, #tpu.dimension_semantics<parallel>], iteration_bounds = array<i64: 1, 2>, scalar_prefetch = 0 : i64, scratch_operands = 0 : i64, tpu.core_type = #tpu.core_type<tc>, window_params = [{transform_indices = @transform_0, window_bounds = array<i64: 1, 16, 64>}, {pipeline_mode = #tpu.pipeline_mode<synchronous>, transform_indices = @transform_1, window_bounds = array<i64: 64, 32>}, {transform_indices = @transform_2, window_bounds = array<i64: 16, 32>}, {transform_indices = @transform_3, window_bounds = array<i64: 1, 16, 32>}]} {
    %c0 = arith.constant 0 : index
    %c0_0 = arith.constant 0 : index
    %c0_1 = arith.constant 0 : index
    %0 = vector.load %arg2[%c0, %c0_0, %c0_1] : memref<1x16x64xbf16, #tpu.memory_space<vmem>>, vector<1x16x64xbf16>
    %1 = vector.shape_cast %0 : vector<1x16x64xbf16> to vector<16x64xbf16>
    %c0_2 = arith.constant 0 : index
    %c0_3 = arith.constant 0 : index
    %2 = vector.load %arg3[%c0_2, %c0_3] : memref<64x32xbf16, #tpu.memory_space<vmem>>, vector<64x32xbf16>
    %cst = arith.constant dense<0.000000e+00> : vector<16x32xf32>
    %3 = tpu.matmul %1, %2, %cst {dimension_numbers = #tpu.dot_dimension_numbers<[1], [0], [0], [1], [0, 0, 1, 1], [], []>} : vector<16x64xbf16>, vector<64x32xbf16>, vector<16x32xf32> -> vector<16x32xf32>
    %c0_4 = arith.constant 0 : index
    %c0_5 = arith.constant 0 : index
    %4 = vector.load %arg4[%c0_4, %c0_5] : memref<16x32xf32, #tpu.memory_space<vmem>>, vector<16x32xf32>
    %5 = arith.addf %3, %4 : vector<16x32xf32>
    %c0_6 = arith.constant 0 : index
    %c0_7 = arith.constant 0 : index
    %c0_8 = arith.constant 0 : index
    %6 = vector.load %arg5[%c0_6, %c0_7, %c0_8] : memref<1x16x32xf32, #tpu.memory_space<vmem>>, vector<1x16x32xf32>
    %7 = vector.shape_cast %6 : vector<1x16x32xf32> to vector<16x32xf32>
    %8 = vector.shape_cast %5 : vector<16x32xf32> to vector<1x16x32xf32>
    tpu.vector_store %arg5[%c0_6, %c0_7, %c0_8], %8 {strides = array<i32>} : memref<1x16x32xf32, #tpu.memory_space<vmem>>, vector<1x16x32xf32>,
    return
  }
  func.func @transform_0(%arg0: i32, %arg1: i32) -> (i32, i32, i32) {
    %c0_i32 = arith.constant 0 : i32
    %c0_i32_0 = arith.constant 0 : i32
    return %arg1, %arg0, %c0_i32 : i32, i32, i32
  }
  func.func @transform_1(%arg0: i32, %arg1: i32) -> (i32, i32) {
    %c0_i32 = arith.constant 0 : i32
    %c0_i32_0 = arith.constant 0 : i32
    %c0_i32_1 = arith.constant 0 : i32
    return %c0_i32, %c0_i32_0 : i32, i32
  }
  func.func @transform_2(%arg0: i32, %arg1: i32) -> (i32, i32) {
    %c0_i32 = arith.constant 0 : i32
    %c0_i32_0 = arith.constant 0 : i32
    return %arg0, %c0_i32 : i32, i32
  }
  func.func @transform_3(%arg0: i32, %arg1: i32) -> (i32, i32, i32) {
    %c0_i32 = arith.constant 0 : i32
    %c0_i32_0 = arith.constant 0 : i32
    return %arg1, %arg0, %c0_i32 : i32, i32, i32
  }
}

</mosaic_0001>

<bundles_post_ra>
// kernel: patched_input_adapter_forward.1
= control target key start
LH: loop header
LB: loop body
LE: loop exit
PB: predicated region body
PF: predicated region fallthrough
CT: control target
= control target key end

     0   :  { %8 = vsyncpa [#allocation3], 0  ;;  %s763_s0 = inlined_call_operand.vmem [shape: bf16[2,16,64], index: 0, kind: input, shape index: {}]   ;;  %s764_s1 = inlined_call_operand.vmem [shape: bf16[64,32], index: 1, kind: input, shape index: {}]   ;;  %s765_s2 = inlined_call_operand.vmem [shape: f32[16,32], index: 2, kind: input, shape index: {}]   ;;  %s766_s3 = inlined_call_operand.hbm [shape: f32[2,16,32], index: 3, kind: output, shape index: {}]  }
   0x1   :  { %10 = vsyncpa [#allocation3 + $0x1], 0  ;;  %s630_s12 = smov 0   ;;  %s632_s13 = smov 0  }
   0x2   :  { %s634_s14 = smov 0   ;;  %s636_s15 = smov 0  }
   0x3   :  { %s638_s16 = smov 0   ;;  %s640_s17 = smov 0  }
   0x4 LB: > { %s422_s18 = sadd.s32 4294967295, %s603_s17   ;;  %s423_s19 = sadd.s32 4294967294, %s603_s17   ;;  %s603_s17 = sphi %s640_s17, %s16_s17   ;;  %s599_s16 = sphi %s638_s16, %s773_s16   ;;  %s595_s15 = sphi %s636_s15, %s772_s15   ;;  %s591_s14 = sphi %s634_s14, %s771_s14   ;;  %s587_s13 = sphi %s632_s13, %s770_s13   ;;  %s583_s12 = sphi %s630_s12, %s769_s12  }
   0x5   : > { %s25_s20 = sadd.s32 1, %s599_s16  ;;  %s112_s21 = sadd.s32 1, %s591_s14 }
   0x6   : > { %p26_p0 = scmp.ge.s32.totalorder %s25_s20, 2  ;;  %p122_p1 = scmp.ne.s32.totalorder %s591_s14, %s587_s13 }
   0x7   : > { %p123_p2 = scmp.eq.s32.totalorder %s422_s18, 1  ;;  %p128_p3 = scmp.ne.s32.totalorder %s587_s13, %s583_s12 }
   0x8   : > { %s775_s20 = smov (%p26_p0, %s25_s20), 0  ;;  %p129_p5 = scmp.eq.s32.totalorder %s423_s19, 1 }
   0x9   : > { %p670_p4 = por %p123_p2, %p122_p1  ;;  %s107_s23 = ssub.s32 %s599_s16, %s775_s20 }
   0xa   : > { %p427_p6 = scmp.ge.s32.totalorder %s603_s17, 1  ;;  %p110_p7 = scmp.eq.s32.totalorder %s107_s23, 0 }
   0xb   : > { %p677_p8 = por %p129_p5, %p128_p3  ;;  %p172_p9 = scmp.lt.s32.totalorder %s603_s17, 3 }
   0xc   : > { %s683_s25 = scalar_select %p110_p7, %s591_s14, %s112_s21  }
   0xd   : > { %p173_p10 = pnand %p427_p6, %p172_p9 }
   0xe   : > { %v520_v0 = vld [vmem:[%s764_s1] sm:$0xff] (!%p173_p10)   ;;  %v605_v1 = vmov (!%p173_p10), 0.0   ;;  %v521_v2 = vld [vmem:[%s764_s1 + $0x8] sm:$0xff] (!%p173_p10)   ;;  %vm606_vm0 = vmmov (!%p173_p10), 0   ;;  %p206_p11 = scmp.lt.s32.totalorder (!%p173_p10), %s595_s15, 1  ;;  %v522_v3 = vld [vmem:[%s764_s1 + $0x10] sm:$0xff] (!%p173_p10)  }
   0xf   : > { %176 = sbr.rel (%p173_p10) target bundleno = 262 (0x106), region = 32  ;;  %449 = vmatprep.subr.bf16.mxu0 (!%p173_p10), %v605_v1  ;;  %457 = vmatprep.mubr.msk.bf16.mxu0 (!%p173_p10), %vm606_vm0, %v605_v1  ;;  %v523_v4 = vld [vmem:[%s764_s1 + $0x18] sm:$0xff] (!%p173_p10)   ;;  %vm264_vm1 = vcmask (!%p173_p10), 523264   ;;  %s202_s18 = sand.u32 (!%p173_p10), 1, %s587_s13   ;;  %v233_v6 = vld [vmem:[%s765_s2] sm:$0xff] (!%p173_p10)  ;;  %vm309_vm2 = vcmask (!%p173_p10), 261120  }
  0x10   : > { %450 = vmatpush3.bf16.msra.mxu0 (!%p173_p10), %v520_v0  ;;  %s428_s19 = sshll.u32 (!%p173_p10), %s202_s18, 4  ;;  %s443_s28 = sshll.u32 (!%p173_p10), %s595_s15, 8  ;;  %v234_v8 = vld [vmem:[%s765_s2 + $0x8] sm:$0xff] (!%p173_p10) }
  0x11   : > { %451 = vmatprep.subr.bf16.mxu0 (!%p173_p10), %v605_v1  ;;  %s204_s26 = scalar_lea.vmem (!%p173_p10), [#allocation2], %s428_s19  ;;  %s607_s8 = smov (!%p173_p10), [#allocation2]  }
  0x12   : > { %s328_s27 = sshll.u32 (!%p173_p10), %s204_s26, 4  ;;  %s710_s27 = int_to_ptr.vmem [resolvable:$true] %s328_s27 }
  0x13   : > { %s525_s7 = scalar_lea.vmem (!%p173_p10), %s710_s27, 256 }
  0x14   : > { %452 = vmatpush3.bf16.msra.mxu0 (!%p173_p10), %v521_v2  ;;  %p526_p12 = scmp.ne.s32.totalorder (!%p173_p10), %s710_s27, %s525_s7 }
  0x15   : > { %453 = vmatprep.subr.bf16.mxu0 (!%p173_p10), %v605_v1 }
  0x16   : > { %s207_s30 = scalar_select %p206_p11, %s595_s15, 1 }
  0x17   : > { %s717_s15 = scalar_lea.sflag [#allocation3], %s202_s18  ;;  %p527_p13 = pnand %p526_p12, %p670_p4 }
  0x18   : > { %s442_s6 = sshll.u32 %s207_s30, 3  ;;  %454 = vmatpush3.bf16.msra.mxu0 %v522_v3 }
  0x19   : > { %s213_s9 = scalar_lea.vmem %s763_s0, %s442_s6  ;;  %455 = vmatprep.subr.bf16.mxu0 %v605_v1  ;;  %s715_s6 = scalar_lea.hbm %s766_s3, %s443_s28 }
  0x1a   : > { %v524_v5 = vld [vmem:[%s213_s9] sm:$0xff]   ;;  %p528_p0 = pneg %p527_p13  ;;  %s529_s9 = sshll.u32 %s607_s8, 4  ;;  %s530_s9 = int_to_ptr.vmem [resolvable:$false] %s529_s9 }
  0x1b   : > { %s531_s10 = scalar_lea.vmem %s530_s9, 512  ;;  %p532_p1 = scmp.lt.s32.totalorder %s710_s27, %s530_s9 }
  0x1c   : > { %456 = vmatpush3.bf16.msra.mxu0 %v523_v4  ;;  %p533_p2 = scmp.lt.s32.totalorder %s531_s10, %s525_s7 }
  0x1e   : > { %p534_p3 = por %p533_p2, %p532_p1 }
  0x1f   : > { %458 = vmatmul.mubr.msk.bf16.vlgmr.msra.gmra.mrb[0].mxu0 %vm264_vm1, %v524_v5 }
  0x20   : > { %p535_p5 = pnand %p534_p3, %p528_p0 }
  0xf2   : > { %v302_v7 = vpop.f32.mrb[0].mxu0 }
  0xf3   : > { %v303_v9 = vadd.f32 %v302_v7, %v233_v6  ;;  %v459_v10 = vpop.f32.mrb[1].mxu0 }
  0xf4   : > { %v305_v11 = vpop.f32.mrb[2].mxu0 }
  0xf5   : > { %310 = vst.msk [vmem:[%s204_s26] sm:$0xff] %vm309_vm2, %v303_v9  ;;  %v306_v12 = vadd.f32 %v305_v11, %v234_v8  ;;  %v460_v13 = vpop.f32.mrb[3].mxu0 }
  0xf7   : > { %311 = vst.msk [vmem:[%s204_s26 + $0x8] sm:$0xff] %vm309_vm2, %v306_v12 }
  0xf8   : > { %538 = shalt.err (!%p535_p5)
}
  0xf9   : > { %s539_s11 = scalar_lea.hbm %s715_s6, 256  ;;  %s543_s21 = scalar_lea.hbm %s766_s3, 512 }
  0xfa   : > { %p540_p6 = scmp.ne.s32.totalorder %s715_s6, %s539_s11  ;;  %p544_p10 = scmp.lt.u32.totalorder %s715_s6, %s766_s3 }
  0xfb   : > { %p545_p11 = scmp.lt.u32.totalorder %s543_s21, %s539_s11  ;;  %p547_p13 = scmp.lt.u32.totalorder %s539_s11, %s715_s6 }
  0xfc   : > { %p541_p7 = pnand %p540_p6, %p670_p4 }
  0xfd   : > { %p546_p12 = por %p545_p11, %p544_p10 }
  0xfe   : > { %p542_p9 = pneg %p541_p7 }
  0xff   : > { %p548_p0 = por %p547_p13, %p546_p12 }
 0x101   : > { %p549_p1 = pnand %p548_p0, %p542_p9 }
 0x103   : > { %552 = shalt.err (!%p549_p1)
}
 0x104   : > { %s608_s28 = smov 128   ;;  %s609_s29 = smov 8  }
 0x105   : > { %461 = dma.vmem_to_hbm [thread:$0]  (%p670_p4), %s710_s27, 256, %s715_s6, %s717_s15, %s608_s28, %s608_s28, %s609_s29  }
 0x106 PF: > { %p467_p2 = scmp.ge.s32.totalorder %s603_s17, 2  ;;  %s343_s30 = sand.u32 1, %s583_s12  }
 0x107   : > { %s344_s4 = scalar_lea.sflag [#allocation3], %s343_s30 }
 0x108   : > { %p464_p3 = pnand %p467_p2, %p677_p8 }
 0x10a   : > { %578 = dma.done.wait (!%p464_p3), %s344_s4, 256  }
 0x10b   : > { %580 = vsyncadd (!%p464_p3), %s344_s4, 4294967040  ;;  %s16_s17 = sadd.s32 1, %s603_s17   ;;  %s769_s12 = smov %s587_s13 }
 0x10c   : > { %p13_p5 = scmp.ge.s32.totalorder %s16_s17, 4   ;;  %s770_s13 = smov %s591_s14 }
 0x10d   : > { %s771_s14 = smov %s683_s25  ;;  %s772_s15 = smov %s599_s16 }
 0x10e   : > { %s773_s16 = smov %s775_s20  ;;  %15 = sbr.rel (!%p13_p5) target bundleno = 4 (0x4), region = 70 }
 0x115   :  { %349 = vsyncpa [#allocation3], 1 }
 0x116   :  { %351 = vsyncpa [#allocation3 + $0x1], 1 }

</bundles_post_ra>
